<compile_context>
chip_gen: v7x
topology: tpu7x:2x2x1
jax: 0.10.0
libtpu: 0.0.40
codegen_flags: <defaults>
</compile_context>

<pallas_src>
import functools

import numpy as np
import jax
import jax.numpy as jnp
from jax.experimental import pallas as pl
from jax.experimental.pallas import tpu as pltpu


_OUT_LANES = 128   # lane-dense output slab width


# ----------------------------------------------------------------------------
# Fused Pallas kernel: whole MAHA eval forward in one invocation
# ----------------------------------------------------------------------------

def maha_fused_kernel(xin_ref, cy_ref, ty_ref, w_ref, b_ref, out_ref, *,
                      x_dim, y_dim, hid_dim, batch, n_ctx, n_tgt, woff, boff):
  f32, bf16 = jnp.float32, jnp.bfloat16
  fea = hid_dim * y_dim * 2
  n_c = batch * n_ctx
  n_t = batch * n_tgt

  def wv(name):                       # static view into the bf16 weight slab
    r, (m, n) = woff[name]
    return w_ref[r:r + m, 0:n]

  def bv(name):                       # static view into the f32 bias slab
    r, (m, n) = boff[name]
    return b_ref[r:r + m, 0:n]

  def mm(a, b):                       # bf16-operand MXU matmul, f32 accumulate
    return jnp.dot(a.astype(bf16), b.astype(bf16), preferred_element_type=f32)

  # ---- shared x_MLP layer 1 on the pre-stacked [Cx; Tx] rows ----------------
  h = jnp.maximum(mm(xin_ref[...], wv("xw1")) + bv("xb1"), 0.0)    # (n_c+n_t, hid)
  h_c = h[:n_c, :]
  h_t = h[n_c:, :]

  # ---- layer 2: context rows -> x0c; target rows -> t0 lane-tiled to fea ----
  # (the tiling matrix is folded into the host-packed weight "xw2t")
  x0c = mm(h_c, wv("xw2c")) + bv("xb2c")                           # (n_c, hid)
  t0_tiled = mm(h_t, wv("xw2t")) + bv("xb2t")                      # (n_t, fea)

  # ---- surrogate set encoder: per-batch mean pool + fused r / z-mu linear ---
  cy = cy_ref[...]
  px = mm(wv("poolc"), x0c)                                        # (B, hid)
  py = mm(wv("poolc"), cy)                                         # (B, y)
  rz = mm(px, wv("rz_wx")) + mm(py, wv("rz_wy")) + bv("rz_b")      # (B, 2*fea)
  rc = rz[:, :fea]                                                 # deterministic latent
  zc = rz[:, fea:]                                                 # eval: mean of z dist

  # ---- W = LayerNorm(rc + W_MLP(zc)) in the fea-wide layout -----------------
  hz = jnp.maximum(mm(zc, wv("bd1")) + bv("bd1_b"), 0.0)
  wm = mm(hz, wv("bd2")) + bv("bd2_b")
  s = rc + wm                                                      # (B, fea)
  mean_b = mm(s, wv("ln_p"))                   # per-hid-chunk means (broadcast)
  d = s - mean_b
  var_b = mm(d * d, wv("ln_p"))
  w_fea = d * jax.lax.rsqrt(var_b + 1e-5) * bv("ln_g") + bv("ln_b")  # (B, fea)

  # ---- param = t0 @ W per batch, scattered into a lane-dense 128-wide slab --
  w_rows = mm(wv("expand"), w_fea)                                 # (n_t, fea)
  param = mm(t0_tiled * w_rows, wv("amat"))                        # (n_t, 128) [mu|omega|0]

  # replace the omega lanes with sigma = 0.1 + 0.9 * softplus(omega)
  # (elementwise masked transform — no cross-lane data movement, no concat)
  col = jax.lax.broadcasted_iota(jnp.int32, (n_t, _OUT_LANES), 1)
  is_sig = (col >= y_dim) & (col < 2 * y_dim)
  sp = jnp.maximum(param, 0.0) + jnp.log1p(jnp.exp(-jnp.abs(param)))
  pred = jnp.where(is_sig, 0.1 + 0.9 * sp, param)                  # (n_t, 128)

  mu = pred[:, :y_dim]
  sigma = pred[:, y_dim:2 * y_dim]

  # ---- losses (eval-mode): NLL = mean_rows(sum_y -logprob), T_MSE = full mean
  ty = ty_ref[...]
  zz = (ty - mu) / sigma
  nll = 0.5 * jnp.log(2.0 * jnp.pi) + jnp.log(sigma) + 0.5 * zz * zz
  se = (ty - mu) ** 2

  inv_rows = 1.0 / float(n_t)
  nll_tot = jnp.sum(jnp.sum(nll, axis=1, keepdims=True),
                    axis=0, keepdims=True) * inv_rows              # (1, 1)
  mse_tot = jnp.sum(jnp.sum(se, axis=1, keepdims=True),
                    axis=0, keepdims=True) * (inv_rows / float(y_dim))

  # ---- single lane-dense output: [pred ; NLL row-block ; MSE row-block] ------
  ones8 = jnp.ones((8, _OUT_LANES), f32)
  out_ref[...] = jnp.concatenate(
      [pred, ones8 * nll_tot, ones8 * mse_tot], axis=0)            # one full store


# ----------------------------------------------------------------------------
# Parameter init (deterministic, PyTorch-style uniform fan-in bounds)
# ----------------------------------------------------------------------------

def _linear_init(key, fan_in, fan_out):
  kw, kb = jax.random.split(key)
  bound = 1.0 / float(np.sqrt(fan_in))
  w = jax.random.uniform(kw, (fan_in, fan_out), jnp.float32, -bound, bound)
  b = jax.random.uniform(kb, (1, fan_out), jnp.float32, -bound, bound)
  return w, b


def init_params(key, x_dim, hid_dim, y_dim):
  fea_dim = hid_dim * y_dim * 2
  keys = jax.random.split(key, 6)
  p = {}
  p["x_w1"], p["x_b1"] = _linear_init(keys[0], x_dim, hid_dim)
  p["x_w2"], p["x_b2"] = _linear_init(keys[1], hid_dim, hid_dim)
  p["r_w"], p["r_b"] = _linear_init(keys[2], hid_dim + y_dim, fea_dim)
  p["z_w"], p["z_b"] = _linear_init(keys[3], hid_dim + y_dim, 2 * fea_dim)
  p["w_w1"], p["w_b1"] = _linear_init(keys[4], hid_dim, hid_dim)
  p["w_w2"], p["w_b2"] = _linear_init(keys[5], hid_dim, hid_dim)
  p["ln_g"] = jnp.ones((1, hid_dim), jnp.float32)
  p["ln_b"] = jnp.zeros((1, hid_dim), jnp.float32)
  return p


# ----------------------------------------------------------------------------
# Host-side one-time repacking into two lane-dense slabs
# ----------------------------------------------------------------------------

def _round_up(x, m):
  return ((x + m - 1) // m) * m


class _SlabPacker:
  """Packs small 2-D tensors into one lane-dense slab at aligned row offsets."""

  def __init__(self, width, row_align):
    self.width = width
    self.row_align = row_align
    self._rows = 0
    self._items = []
    self.offsets = {}

  def add(self, name, arr):
    arr = np.asarray(arr, np.float32)
    assert arr.ndim == 2 and arr.shape[1] <= self.width, (name, arr.shape)
    self.offsets[name] = (self._rows, arr.shape)
    self._items.append((self._rows, arr))
    self._rows += _round_up(arr.shape[0], self.row_align)

  def finalize(self, dtype):
    total = _round_up(max(self._rows, self.row_align), self.row_align)
    slab = np.zeros((total, self.width), np.float32)
    for r, arr in self._items:
      slab[r:r + arr.shape[0], :arr.shape[1]] = arr
    return jnp.asarray(slab, dtype), self.offsets


def pack_params(p, x_dim, hid_dim, y_dim, B, Nc, Nt):
  fea = hid_dim * y_dim * 2
  two_y = 2 * y_dim
  f32 = np.float32
  width = _round_up(max(2 * fea, _OUT_LANES), 128)

  def blockdiag(w):
    w = np.asarray(w, f32)
    out = np.zeros((fea, fea), f32)
    for j in range(two_y):
      out[j * hid_dim:(j + 1) * hid_dim, j * hid_dim:(j + 1) * hid_dim] = w
    return out

  rw, rb = np.asarray(p["r_w"], f32), np.asarray(p["r_b"], f32)
  zw, zb = np.asarray(p["z_w"], f32), np.asarray(p["z_b"], f32)

  poolc = np.zeros((B, B * Nc), f32)             # per-batch mean pool over set
  for b in range(B):
    poolc[b, b * Nc:(b + 1) * Nc] = 1.0 / Nc
  expand = np.zeros((B * Nt, B), f32)            # row-expand batch -> target rows
  for b in range(B):
    expand[b * Nt:(b + 1) * Nt, b] = 1.0
  amat = np.zeros((fea, _OUT_LANES), f32)        # chunk-sum, scattered lane-dense
  for c in range(two_y):
    amat[c * hid_dim:(c + 1) * hid_dim, c] = 1.0

  # ---- bf16 weight slab (all MXU operands) ----------------------------------
  wp = _SlabPacker(width, row_align=16)
  wp.add("xw1", p["x_w1"])
  wp.add("xw2c", p["x_w2"])
  wp.add("xw2t", np.tile(np.asarray(p["x_w2"], f32), (1, two_y)))  # tmat folded in
  wp.add("rz_wx", np.concatenate([rw[:hid_dim], zw[:hid_dim, :fea]], axis=1))
  wp.add("rz_wy", np.concatenate([rw[hid_dim:], zw[hid_dim:, :fea]], axis=1))
  wp.add("poolc", poolc)
  wp.add("bd1", blockdiag(p["w_w1"]))
  wp.add("bd2", blockdiag(p["w_w2"]))
  wp.add("ln_p", blockdiag(np.full((hid_dim, hid_dim), 1.0 / hid_dim, f32)))
  wp.add("expand", expand)
  wp.add("amat", amat)
  wslab, woff = wp.finalize(jnp.bfloat16)

  # ---- f32 bias / affine slab (added post-matmul, kept full precision) -------
  bp = _SlabPacker(width, row_align=8)
  bp.add("xb1", p["x_b1"])
  bp.add("xb2c", p["x_b2"])
  bp.add("xb2t", np.tile(np.asarray(p["x_b2"], f32), (1, two_y)))
  bp.add("rz_b", np.concatenate([rb, zb[:, :fea]], axis=1))
  bp.add("bd1_b", np.tile(np.asarray(p["w_b1"], f32), (1, two_y)))
  bp.add("bd2_b", np.tile(np.asarray(p["w_b2"], f32), (1, two_y)))
  bp.add("ln_g", np.tile(np.asarray(p["ln_g"], f32), (1, two_y)))
  bp.add("ln_b", np.tile(np.asarray(p["ln_b"], f32), (1, two_y)))
  bslab, boff = bp.finalize(jnp.float32)

  return {"wslab": wslab, "bslab": bslab, "woff": woff, "boff": boff}


# ----------------------------------------------------------------------------
# MAHA forward (eval mode) — single pallas_call
# ----------------------------------------------------------------------------

def _fs(shape):
  nd = len(shape)
  return pl.BlockSpec(shape, lambda i, _nd=nd: (0,) * _nd)


def maha_forward(packed, C, T, x_dim, hid_dim, y_dim):
  B, Nc, _ = C.shape
  _, Nt, _ = T.shape
  n_c, n_t = B * Nc, B * Nt
  fea = hid_dim * y_dim * 2

  # host-side (XLA) layout plumbing: pre-split / pre-stack the data inputs
  Cx = C[..., :x_dim].reshape(n_c, x_dim)
  Tx = T[..., :x_dim].reshape(n_t, x_dim)
  cy = C[..., -y_dim:].reshape(n_c, y_dim)
  ty = T[..., -y_dim:].reshape(n_t, y_dim)
  x_in = jnp.concatenate([Cx, Tx], axis=0)

  kern = functools.partial(
      maha_fused_kernel, x_dim=x_dim, y_dim=y_dim, hid_dim=hid_dim,
      batch=B, n_ctx=Nc, n_tgt=Nt, woff=packed["woff"], boff=packed["boff"])

  in_arrays = (x_in, cy, ty, packed["wslab"], packed["bslab"])
  out_rows = n_t + 16

  # cost estimate from the actual shapes
  mm_flops = 2 * (
      (n_c + n_t) * x_dim * hid_dim          # x_MLP layer 1
      + n_c * hid_dim * hid_dim              # layer 2 (context)
      + n_t * hid_dim * fea                  # layer 2 (target, tiled)
      + B * n_c * (hid_dim + y_dim)          # mean pooling
      + B * (hid_dim + y_dim) * 2 * fea      # fused r/z linear
      + 2 * B * fea * fea                    # W_MLP (bd1 + bd2)
      + 2 * B * fea * fea                    # LN mean + var
      + n_t * B * fea                        # row expand
      + n_t * fea * _OUT_LANES)              # param scatter
  trans = 2 * n_t * _OUT_LANES + B * fea + 2 * n_t * y_dim
  bytes_acc = sum(int(np.prod(a.shape)) * a.dtype.itemsize for a in in_arrays)
  bytes_acc += out_rows * _OUT_LANES * 4

  # TODO(synk): at production sizes add a "parallel" grid axis over target-row
  # tiles (v7x megacore) and pass raw (hid,hid) W_MLP weights instead of the
  # O(fea^2) block-diagonal packing (v7x 64 MiB VMEM). Unnecessary at toy size.
  out = pl.pallas_call(
      kern,
      out_shape=jax.ShapeDtypeStruct((out_rows, _OUT_LANES), jnp.float32),
      grid=(1,),
      in_specs=[_fs(a.shape) for a in in_arrays],
      out_specs=_fs((out_rows, _OUT_LANES)),
      compiler_params=pltpu.CompilerParams(
          dimension_semantics=("arbitrary",)),
      cost_estimate=pl.CostEstimate(
          flops=int(mm_flops), transcendentals=int(trans),
          bytes_accessed=int(bytes_acc)),
  )(*in_arrays)

  NLL = out[n_t, 0]
  T_MSE = out[n_t + 8, 0]
  Ty_hat = out[:n_t, :y_dim].reshape(B, Nt, y_dim)
  sigma = out[:n_t, y_dim:2 * y_dim].reshape(B, Nt, y_dim)
  loss = NLL   # eval mode: KL = aux_NLL = aux_ENT = 0
  return loss, NLL, T_MSE, Ty_hat, sigma


# ----------------------------------------------------------------------------
# Main
# ----------------------------------------------------------------------------

if __name__ == "__main__":
  x_dim, y_dim, hid_dim = 4, 2, 32
  B, Nc, Nt = 2, 8, 8

  key = jax.random.PRNGKey(0)
  kp, kc, kt = jax.random.split(key, 3)

  params = init_params(kp, x_dim, hid_dim, y_dim)
  packed = pack_params(params, x_dim, hid_dim, y_dim, B, Nc, Nt)

  C = jax.random.normal(kc, (B, Nc, x_dim + y_dim), jnp.float32)
  T = jax.random.normal(kt, (B, Nt, x_dim + y_dim), jnp.float32)

  loss, NLL, T_MSE, Ty_hat, sigma = maha_forward(packed, C, T, x_dim, hid_dim, y_dim)
  jax.block_until_ready((loss, NLL, T_MSE, Ty_hat, sigma))
  print("KERNEL_OK")
</pallas_src>

<mosaic_0001>
module attributes {stable_mosaic.version = 11 : i64} {
  func.func @maha_fused_kernel(%arg0: i32, %arg1: memref<32x4xf32, #tpu.memory_space<vmem>>, %arg2: memref<16x2xf32, #tpu.memory_space<vmem>>, %arg3: memref<16x2xf32, #tpu.memory_space<vmem>>, %arg4: memref<672x256xbf16, #tpu.memory_space<vmem>>, %arg5: memref<64x256xf32, #tpu.memory_space<vmem>>, %arg6: memref<32x128xf32, #tpu.memory_space<vmem>>) attributes {dimension_semantics = [#tpu.dimension_semantics<arbitrary>], iteration_bounds = array<i64: 1>, scalar_prefetch = 0 : i64, scratch_operands = 0 : i64, tpu.core_type = #tpu.core_type<tc>, window_params = [{pipeline_mode = #tpu.pipeline_mode<synchronous>, transform_indices = @transform_0, window_bounds = array<i64: 32, 4>}, {pipeline_mode = #tpu.pipeline_mode<synchronous>, transform_indices = @transform_1, window_bounds = array<i64: 16, 2>}, {pipeline_mode = #tpu.pipeline_mode<synchronous>, transform_indices = @transform_2, window_bounds = array<i64: 16, 2>}, {pipeline_mode = #tpu.pipeline_mode<synchronous>, transform_indices = @transform_3, window_bounds = array<i64: 672, 256>}, {pipeline_mode = #tpu.pipeline_mode<synchronous>, transform_indices = @transform_4, window_bounds = array<i64: 64, 256>}, {pipeline_mode = #tpu.pipeline_mode<synchronous>, transform_indices = @transform_5, window_bounds = array<i64: 32, 128>}]} {
    %c0 = arith.constant 0 : index
    %c0_0 = arith.constant 0 : index
    %0 = vector.load %arg1[%c0, %c0_0] : memref<32x4xf32, #tpu.memory_space<vmem>>, vector<32x4xf32>
    %c0_1 = arith.constant 0 : index
    %c0_2 = arith.constant 0 : index
    %1 = vector.load %arg4[%c0_1, %c0_2] : memref<672x256xbf16, #tpu.memory_space<vmem>>, vector<4x32xbf16>
    %2 = arith.truncf %0 : vector<32x4xf32> to vector<32x4xbf16>
    %cst = arith.constant dense<0.000000e+00> : vector<32x32xf32>
    %3 = tpu.matmul %2, %1, %cst {dimension_numbers = #tpu.dot_dimension_numbers<[1], [0], [0], [1], [0, 0, 1, 1], [], []>} : vector<32x4xbf16>, vector<4x32xbf16>, vector<32x32xf32> -> vector<32x32xf32>
    %c0_3 = arith.constant 0 : index
    %c0_4 = arith.constant 0 : index
    %4 = vector.load %arg5[%c0_3, %c0_4] : memref<64x256xf32, #tpu.memory_space<vmem>>, vector<1x32xf32>
    %5 = vector.broadcast %4 : vector<1x32xf32> to vector<32x32xf32>
    %6 = arith.addf %3, %5 : vector<32x32xf32>
    %cst_5 = arith.constant 0.000000e+00 : f32
    %7 = vector.broadcast %cst_5 : f32 to vector<32x32xf32>
    %8 = arith.maximumf %6, %7 : vector<32x32xf32>
    %9 = vector.extract_strided_slice %8 {offsets = [0, 0], sizes = [16, 32], strides = [1, 1]} : vector<32x32xf32> to vector<16x32xf32>
    %10 = vector.extract_strided_slice %8 {offsets = [16, 0], sizes = [16, 32], strides = [1, 1]} : vector<32x32xf32> to vector<16x32xf32>
    %c16 = arith.constant 16 : index
    %c0_6 = arith.constant 0 : index
    %11 = vector.load %arg4[%c16, %c0_6] : memref<672x256xbf16, #tpu.memory_space<vmem>>, vector<32x32xbf16>
    %12 = arith.truncf %9 : vector<16x32xf32> to vector<16x32xbf16>
    %cst_7 = arith.constant dense<0.000000e+00> : vector<16x32xf32>
    %13 = tpu.matmul %12, %11, %cst_7 {dimension_numbers = #tpu.dot_dimension_numbers<[1], [0], [0], [1], [0, 0, 1, 1], [], []>} : vector<16x32xbf16>, vector<32x32xbf16>, vector<16x32xf32> -> vector<16x32xf32>
    %c8 = arith.constant 8 : index
    %c0_8 = arith.constant 0 : index
    %14 = vector.load %arg5[%c8, %c0_8] : memref<64x256xf32, #tpu.memory_space<vmem>>, vector<1x32xf32>
    %15 = vector.broadcast %14 : vector<1x32xf32> to vector<16x32xf32>
    %16 = arith.addf %13, %15 : vector<16x32xf32>
    %c48 = arith.constant 48 : index
    %c0_9 = arith.constant 0 : index
    %17 = vector.load %arg4[%c48, %c0_9] : memref<672x256xbf16, #tpu.memory_space<vmem>>, vector<32x128xbf16>
    %18 = arith.truncf %10 : vector<16x32xf32> to vector<16x32xbf16>
    %cst_10 = arith.constant dense<0.000000e+00> : vector<16x128xf32>
    %19 = tpu.matmul %18, %17, %cst_10 {dimension_numbers = #tpu.dot_dimension_numbers<[1], [0], [0], [1], [0, 0, 1, 1], [], []>} : vector<16x32xbf16>, vector<32x128xbf16>, vector<16x128xf32> -> vector<16x128xf32>
    %c16_11 = arith.constant 16 : index
    %c0_12 = arith.constant 0 : index
    %20 = vector.load %arg5[%c16_11, %c0_12] : memref<64x256xf32, #tpu.memory_space<vmem>>, vector<1x128xf32>
    %21 = vector.broadcast %20 : vector<1x128xf32> to vector<16x128xf32>
    %22 = arith.addf %19, %21 : vector<16x128xf32>
    %c0_13 = arith.constant 0 : index
    %c0_14 = arith.constant 0 : index
    %23 = vector.load %arg2[%c0_13, %c0_14] : memref<16x2xf32, #tpu.memory_space<vmem>>, vector<16x2xf32>
    %c128 = arith.constant 128 : index
    %c0_15 = arith.constant 0 : index
    %24 = vector.load %arg4[%c128, %c0_15] : memref<672x256xbf16, #tpu.memory_space<vmem>>, vector<2x16xbf16>
    %25 = arith.truncf %16 : vector<16x32xf32> to vector<16x32xbf16>
    %cst_16 = arith.constant dense<0.000000e+00> : vector<2x32xf32>
    %26 = tpu.matmul %24, %25, %cst_16 {dimension_numbers = #tpu.dot_dimension_numbers<[1], [0], [0], [1], [0, 0, 1, 1], [], []>} : vector<2x16xbf16>, vector<16x32xbf16>, vector<2x32xf32> -> vector<2x32xf32>
    %c128_17 = arith.constant 128 : index
    %c0_18 = arith.constant 0 : index
    %27 = vector.load %arg4[%c128_17, %c0_18] : memref<672x256xbf16, #tpu.memory_space<vmem>>, vector<2x16xbf16>
    %28 = arith.truncf %23 : vector<16x2xf32> to vector<16x2xbf16>
    %cst_19 = arith.constant dense<0.000000e+00> : vector<2x2xf32>
    %29 = tpu.matmul %27, %28, %cst_19 {dimension_numbers = #tpu.dot_dimension_numbers<[1], [0], [0], [1], [0, 0, 1, 1], [], []>} : vector<2x16xbf16>, vector<16x2xbf16>, vector<2x2xf32> -> vector<2x2xf32>
    %c80 = arith.constant 80 : index
    %c0_20 = arith.constant 0 : index
    %30 = vector.load %arg4[%c80, %c0_20] : memref<672x256xbf16, #tpu.memory_space<vmem>>, vector<32x256xbf16>
    %31 = arith.truncf %26 : vector<2x32xf32> to vector<2x32xbf16>
    %cst_21 = arith.constant dense<0.000000e+00> : vector<2x256xf32>
    %32 = tpu.matmul %31, %30, %cst_21 {dimension_numbers = #tpu.dot_dimension_numbers<[1], [0], [0], [1], [0, 0, 1, 1], [], []>} : vector<2x32xbf16>, vector<32x256xbf16>, vector<2x256xf32> -> vector<2x256xf32>
    %c112 = arith.constant 112 : index
    %c0_22 = arith.constant 0 : index
    %33 = vector.load %arg4[%c112, %c0_22] : memref<672x256xbf16, #tpu.memory_space<vmem>>, vector<2x256xbf16>
    %34 = arith.truncf %29 : vector<2x2xf32> to vector<2x2xbf16>
    %cst_23 = arith.constant dense<0.000000e+00> : vector<2x256xf32>
    %35 = tpu.matmul %34, %33, %cst_23 {dimension_numbers = #tpu.dot_dimension_numbers<[1], [0], [0], [1], [0, 0, 1, 1], [], []>} : vector<2x2xbf16>, vector<2x256xbf16>, vector<2x256xf32> -> vector<2x256xf32>
    %36 = arith.addf %32, %35 : vector<2x256xf32>
    %c24 = arith.constant 24 : index
    %c0_24 = arith.constant 0 : index
    %37 = vector.load %arg5[%c24, %c0_24] : memref<64x256xf32, #tpu.memory_space<vmem>>, vector<1x256xf32>
    %38 = vector.broadcast %37 : vector<1x256xf32> to vector<2x256xf32>
    %39 = arith.addf %36, %38 : vector<2x256xf32>
    %40 = vector.extract_strided_slice %39 {offsets = [0, 0], sizes = [2, 128], strides = [1, 1]} : vector<2x256xf32> to vector<2x128xf32>
    %41 = vector.extract_strided_slice %39 {offsets = [0, 128], sizes = [2, 128], strides = [1, 1]} : vector<2x256xf32> to vector<2x128xf32>
    %c144 = arith.constant 144 : index
    %c0_25 = arith.constant 0 : index
    %42 = vector.load %arg4[%c144, %c0_25] : memref<672x256xbf16, #tpu.memory_space<vmem>>, vector<128x128xbf16>
    %43 = arith.truncf %41 : vector<2x128xf32> to vector<2x128xbf16>
    %cst_26 = arith.constant dense<0.000000e+00> : vector<2x128xf32>
    %44 = tpu.matmul %43, %42, %cst_26 {dimension_numbers = #tpu.dot_dimension_numbers<[1], [0], [0], [1], [0, 0, 1, 1], [], []>} : vector<2x128xbf16>, vector<128x128xbf16>, vector<2x128xf32> -> vector<2x128xf32>
    %c32 = arith.constant 32 : index
    %c0_27 = arith.constant 0 : index
    %45 = vector.load %arg5[%c32, %c0_27] : memref<64x256xf32, #tpu.memory_space<vmem>>, vector<1x128xf32>
    %46 = vector.broadcast %45 : vector<1x128xf32> to vector<2x128xf32>
    %47 = arith.addf %44, %46 : vector<2x128xf32>
    %cst_28 = arith.constant 0.000000e+00 : f32
    %48 = vector.broadcast %cst_28 : f32 to vector<2x128xf32>
    %49 = arith.maximumf %47, %48 : vector<2x128xf32>
    %c272 = arith.constant 272 : index
    %c0_29 = arith.constant 0 : index
    %50 = vector.load %arg4[%c272, %c0_29] : memref<672x256xbf16, #tpu.memory_space<vmem>>, vector<128x128xbf16>
    %51 = arith.truncf %49 : vector<2x128xf32> to vector<2x128xbf16>
    %cst_30 = arith.constant dense<0.000000e+00> : vector<2x128xf32>
    %52 = tpu.matmul %51, %50, %cst_30 {dimension_numbers = #tpu.dot_dimension_numbers<[1], [0], [0], [1], [0, 0, 1, 1], [], []>} : vector<2x128xbf16>, vector<128x128xbf16>, vector<2x128xf32> -> vector<2x128xf32>
    %c40 = arith.constant 40 : index
    %c0_31 = arith.constant 0 : index
    %53 = vector.load %arg5[%c40, %c0_31] : memref<64x256xf32, #tpu.memory_space<vmem>>, vector<1x128xf32>
    %54 = vector.broadcast %53 : vector<1x128xf32> to vector<2x128xf32>
    %55 = arith.addf %52, %54 : vector<2x128xf32>
    %56 = arith.addf %40, %55 : vector<2x128xf32>
    %c400 = arith.constant 400 : index
    %c0_32 = arith.constant 0 : index
    %57 = vector.load %arg4[%c400, %c0_32] : memref<672x256xbf16, #tpu.memory_space<vmem>>, vector<128x128xbf16>
    %58 = arith.truncf %56 : vector<2x128xf32> to vector<2x128xbf16>
    %cst_33 = arith.constant dense<0.000000e+00> : vector<2x128xf32>
    %59 = tpu.matmul %58, %57, %cst_33 {dimension_numbers = #tpu.dot_dimension_numbers<[1], [0], [0], [1], [0, 0, 1, 1], [], []>} : vector<2x128xbf16>, vector<128x128xbf16>, vector<2x128xf32> -> vector<2x128xf32>
    %60 = arith.subf %56, %59 : vector<2x128xf32>
    %61 = arith.mulf %60, %60 : vector<2x128xf32>
    %c400_34 = arith.constant 400 : index
    %c0_35 = arith.constant 0 : index
    %62 = vector.load %arg4[%c400_34, %c0_35] : memref<672x256xbf16, #tpu.memory_space<vmem>>, vector<128x128xbf16>
    %63 = arith.truncf %61 : vector<2x128xf32> to vector<2x128xbf16>
    %cst_36 = arith.constant dense<0.000000e+00> : vector<2x128xf32>
    %64 = tpu.matmul %63, %62, %cst_36 {dimension_numbers = #tpu.dot_dimension_numbers<[1], [0], [0], [1], [0, 0, 1, 1], [], []>} : vector<2x128xbf16>, vector<128x128xbf16>, vector<2x128xf32> -> vector<2x128xf32>
    %cst_37 = arith.constant 9.99999974E-6 : f32
    %65 = vector.broadcast %cst_37 : f32 to vector<2x128xf32>
    %66 = arith.addf %64, %65 : vector<2x128xf32>
    %67 = math.rsqrt %66 : vector<2x128xf32>
    %68 = arith.mulf %60, %67 : vector<2x128xf32>
    %c48_38 = arith.constant 48 : index
    %c0_39 = arith.constant 0 : index
    %69 = vector.load %arg5[%c48_38, %c0_39] : memref<64x256xf32, #tpu.memory_space<vmem>>, vector<1x128xf32>
    %70 = vector.broadcast %69 : vector<1x128xf32> to vector<2x128xf32>
    %71 = arith.mulf %68, %70 : vector<2x128xf32>
    %c56 = arith.constant 56 : index
    %c0_40 = arith.constant 0 : index
    %72 = vector.load %arg5[%c56, %c0_40] : memref<64x256xf32, #tpu.memory_space<vmem>>, vector<1x128xf32>
    %73 = vector.broadcast %72 : vector<1x128xf32> to vector<2x128xf32>
    %74 = arith.addf %71, %73 : vector<2x128xf32>
    %c528 = arith.constant 528 : index
    %c0_41 = arith.constant 0 : index
    %75 = vector.load %arg4[%c528, %c0_41] : memref<672x256xbf16, #tpu.memory_space<vmem>>, vector<16x2xbf16>
    %76 = arith.truncf %74 : vector<2x128xf32> to vector<2x128xbf16>
    %cst_42 = arith.constant dense<0.000000e+00> : vector<16x128xf32>
    %77 = tpu.matmul %75, %76, %cst_42 {dimension_numbers = #tpu.dot_dimension_numbers<[1], [0], [0], [1], [0, 0, 1, 1], [], []>} : vector<16x2xbf16>, vector<2x128xbf16>, vector<16x128xf32> -> vector<16x128xf32>
    %78 = arith.mulf %22, %77 : vector<16x128xf32>
    %c544 = arith.constant 544 : index
    %c0_43 = arith.constant 0 : index
    %79 = vector.load %arg4[%c544, %c0_43] : memref<672x256xbf16, #tpu.memory_space<vmem>>, vector<128x128xbf16>
    %80 = arith.truncf %78 : vector<16x128xf32> to vector<16x128xbf16>
    %cst_44 = arith.constant dense<0.000000e+00> : vector<16x128xf32>
    %81 = tpu.matmul %80, %79, %cst_44 {dimension_numbers = #tpu.dot_dimension_numbers<[1], [0], [0], [1], [0, 0, 1, 1], [], []>} : vector<16x128xbf16>, vector<128x128xbf16>, vector<16x128xf32> -> vector<16x128xf32>
    %82 = tpu.iota {dimensions = array<i32: 1>} : vector<16x128xi32>
    %c2_i32 = arith.constant 2 : i32
    %83 = vector.broadcast %c2_i32 : i32 to vector<16x128xi32>
    %84 = arith.cmpi sge, %82, %83 : vector<16x128xi32>
    %c4_i32 = arith.constant 4 : i32
    %85 = vector.broadcast %c4_i32 : i32 to vector<16x128xi32>
    %86 = arith.cmpi slt, %82, %85 : vector<16x128xi32>
    %87 = arith.andi %84, %86 : vector<16x128xi1>
    %cst_45 = arith.constant 0.000000e+00 : f32
    %88 = vector.broadcast %cst_45 : f32 to vector<16x128xf32>
    %89 = arith.maximumf %81, %88 : vector<16x128xf32>
    %90 = math.absf %81 : vector<16x128xf32>
    %cst_46 = arith.constant 0.000000e+00 : f32
    %91 = vector.broadcast %cst_46 : f32 to vector<16x128xf32>
    %92 = arith.subf %91, %90 : vector<16x128xf32>
    %93 = math.exp %92 : vector<16x128xf32>
    %94 = math.log1p %93 : vector<16x128xf32>
    %95 = arith.addf %89, %94 : vector<16x128xf32>
    %cst_47 = arith.constant 0.899999976 : f32
    %96 = vector.broadcast %cst_47 : f32 to vector<16x128xf32>
    %97 = arith.mulf %96, %95 : vector<16x128xf32>
    %cst_48 = arith.constant 1.000000e-01 : f32
    %98 = vector.broadcast %cst_48 : f32 to vector<16x128xf32>
    %99 = arith.addf %98, %97 : vector<16x128xf32>
    %100 = arith.select %87, %99, %81 : vector<16x128xi1>, vector<16x128xf32>
    %101 = vector.extract_strided_slice %100 {offsets = [0, 0], sizes = [16, 2], strides = [1, 1]} : vector<16x128xf32> to vector<16x2xf32>
    %102 = vector.extract_strided_slice %100 {offsets = [0, 2], sizes = [16, 2], strides = [1, 1]} : vector<16x128xf32> to vector<16x2xf32>
    %c0_49 = arith.constant 0 : index
    %c0_50 = arith.constant 0 : index
    %103 = vector.load %arg3[%c0_49, %c0_50] : memref<16x2xf32, #tpu.memory_space<vmem>>, vector<16x2xf32>
    %104 = arith.subf %103, %101 : vector<16x2xf32>
    %105 = arith.divf %104, %102 : vector<16x2xf32>
    %cst_51 = arith.constant 6.28318548 : f32
    %106 = math.log %cst_51 : f32
    %cst_52 = arith.constant 5.000000e-01 : f32
    %107 = arith.mulf %cst_52, %106 : f32
    %108 = math.log %102 : vector<16x2xf32>
    %109 = vector.broadcast %107 : f32 to vector<16x2xf32>
    %110 = arith.addf %109, %108 : vector<16x2xf32>
    %cst_53 = arith.constant 5.000000e-01 : f32
    %111 = vector.broadcast %cst_53 : f32 to vector<16x2xf32>
    %112 = arith.mulf %111, %105 : vector<16x2xf32>
    %113 = arith.mulf %112, %105 : vector<16x2xf32>
    %114 = arith.addf %110, %113 : vector<16x2xf32>
    %115 = arith.subf %103, %101 : vector<16x2xf32>
    %116 = arith.mulf %115, %115 : vector<16x2xf32>
    %cst_54 = arith.constant dense<0.000000e+00> : vector<16xf32>
    %117 = vector.multi_reduction <add>, %114, %cst_54 [1] : vector<16x2xf32> to vector<16xf32>
    %118 = vector.shape_cast %117 : vector<16xf32> to vector<16x1xf32>
    %cst_55 = arith.constant dense<0.000000e+00> : vector<1xf32>
    %119 = vector.multi_reduction <add>, %118, %cst_55 [0] : vector<16x1xf32> to vector<1xf32>
    %120 = vector.shape_cast %119 : vector<1xf32> to vector<1x1xf32>
    %cst_56 = arith.constant 6.250000e-02 : f32
    %121 = vector.broadcast %cst_56 : f32 to vector<1x1xf32>
    %122 = arith.mulf %120, %121 : vector<1x1xf32>
    %cst_57 = arith.constant dense<0.000000e+00> : vector<16xf32>
    %123 = vector.multi_reduction <add>, %116, %cst_57 [1] : vector<16x2xf32> to vector<16xf32>
    %124 = vector.shape_cast %123 : vector<16xf32> to vector<16x1xf32>
    %cst_58 = arith.constant dense<0.000000e+00> : vector<1xf32>
    %125 = vector.multi_reduction <add>, %124, %cst_58 [0] : vector<16x1xf32> to vector<1xf32>
    %126 = vector.shape_cast %125 : vector<1xf32> to vector<1x1xf32>
    %cst_59 = arith.constant 3.125000e-02 : f32
    %127 = vector.broadcast %cst_59 : f32 to vector<1x1xf32>
    %128 = arith.mulf %126, %127 : vector<1x1xf32>
    %cst_60 = arith.constant 1.000000e+00 : f32
    %129 = vector.broadcast %cst_60 : f32 to vector<8x128xf32>
    %130 = vector.broadcast %122 : vector<1x1xf32> to vector<8x128xf32>
    %131 = arith.mulf %129, %130 : vector<8x128xf32>
    %132 = vector.broadcast %128 : vector<1x1xf32> to vector<8x128xf32>
    %133 = arith.mulf %129, %132 : vector<8x128xf32>
    %134 = tpu.concatenate %100, %131, %133 in 0 : vector<16x128xf32>, vector<8x128xf32>, vector<8x128xf32> -> vector<32x128xf32>
    %c0_61 = arith.constant 0 : index
    %c0_62 = arith.constant 0 : index
    %135 = vector.load %arg6[%c0_61, %c0_62] : memref<32x128xf32, #tpu.memory_space<vmem>>, vector<32x128xf32>
    tpu.vector_store %arg6[%c0_61, %c0_62], %134 {strides = array<i32>} : memref<32x128xf32, #tpu.memory_space<vmem>>, vector<32x128xf32>,
    return
  }
  func.func @transform_0(%arg0: i32) -> (i32, i32) {
    %c0_i32 = arith.constant 0 : i32
    %c0_i32_0 = arith.constant 0 : i32
    %c0_i32_1 = arith.constant 0 : i32
    return %c0_i32, %c0_i32_0 : i32, i32
  }
  func.func @transform_1(%arg0: i32) -> (i32, i32) {
    %c0_i32 = arith.constant 0 : i32
    %c0_i32_0 = arith.constant 0 : i32
    %c0_i32_1 = arith.constant 0 : i32
    return %c0_i32, %c0_i32_0 : i32, i32
  }
  func.func @transform_2(%arg0: i32) -> (i32, i32) {
    %c0_i32 = arith.constant 0 : i32
    %c0_i32_0 = arith.constant 0 : i32
    %c0_i32_1 = arith.constant 0 : i32
    return %c0_i32, %c0_i32_0 : i32, i32
  }
  func.func @transform_3(%arg0: i32) -> (i32, i32) {
    %c0_i32 = arith.constant 0 : i32
    %c0_i32_0 = arith.constant 0 : i32
    %c0_i32_1 = arith.constant 0 : i32
    return %c0_i32, %c0_i32_0 : i32, i32
  }
  func.func @transform_4(%arg0: i32) -> (i32, i32) {
    %c0_i32 = arith.constant 0 : i32
    %c0_i32_0 = arith.constant 0 : i32
    %c0_i32_1 = arith.constant 0 : i32
    return %c0_i32, %c0_i32_0 : i32, i32
  }
  func.func @transform_5(%arg0: i32) -> (i32, i32) {
    %c0_i32 = arith.constant 0 : i32
    %c0_i32_0 = arith.constant 0 : i32
    %c0_i32_1 = arith.constant 0 : i32
    return %c0_i32, %c0_i32_0 : i32, i32
  }
}

</mosaic_0001>

<bundles_post_ra>
// kernel: tpu_custom_call.1
= control target key start
LH: loop header
LB: loop body
LE: loop exit
PB: predicated region body
PF: predicated region fallthrough
CT: control target
= control target key end

     0   :  { %10 = vsyncpa [#allocation3], 0  ;;  %s1752_s0 = inlined_call_operand.vmem [shape: f32[32,4], index: 0, kind: input, shape index: {}]   ;;  %s1753_s1 = inlined_call_operand.vmem [shape: f32[16,2], index: 1, kind: input, shape index: {}]   ;;  %s1754_s2 = inlined_call_operand.vmem [shape: f32[16,2], index: 2, kind: input, shape index: {}]   ;;  %s1755_s3 = inlined_call_operand.hbm [shape: bf16[672,256], index: 3, kind: input, shape index: {}]   ;;  %s1756_s4 = inlined_call_operand.hbm [shape: f32[64,256], index: 4, kind: input, shape index: {}]   ;;  %s1757_s5 = inlined_call_operand.hbm [shape: f32[32,128], index: 5, kind: output, shape index: {}]  }
   0x1   :  { %11 = vsyncpa [#allocation6], 0 }
   0x2   :  { %12 = vsyncpa [#allocation4], 0  ;;  %s1548_s18 = smov [#allocation2]   ;;  %s1476_s22 = scalar_lea.hbm %s1755_s3, 10752 }
   0x3   :  { %s24_s19 = sshll.u32 %s1548_s18, 4  ;;  %p1477_p0 = scmp.ne.s32.totalorder %s1755_s3, %s1476_s22  ;;  %s25_s19 = int_to_ptr.vmem [resolvable:$true] %s24_s19 }
   0x4   :  { %p1480_p1 = scmp.lt.u32.totalorder %s1476_s22, %s1755_s3 }
   0x6   :  { %p1482_p2 = pnand %p1480_p1, %p1477_p0 }
   0x8   :  { %1485 = shalt.err (!%p1482_p2)
}
   0x9   :  { %s1486_s27 = scalar_lea.vmem %s25_s19, 10752  ;;  %p1491_p4 = scmp.lt.s32.totalorder %s25_s19, %s25_s19 }
   0xa   :  { %p1487_p3 = scmp.ne.s32.totalorder %s25_s19, %s1486_s27  ;;  %p1492_p5 = scmp.lt.s32.totalorder %s1486_s27, %s1486_s27 }
   0xc   :  { %p1493_p6 = por %p1492_p5, %p1491_p4 }
   0xe   :  { %p1494_p7 = pnand %p1493_p6, %p1487_p3 }
  0x10   :  { %1497 = shalt.err (!%p1494_p7)
}
  0x11   :  { %s1549_s28 = smov 128   ;;  %s1550_s29 = smov 8  }
  0x12   :  { %30 = dma.hbm_to_vmem [thread:$0]  %s1755_s3, 10752, %s25_s19, [#allocation3], %s1549_s28, %s1549_s28, %s1550_s29  }
  0x13   :  { %s1551_s7 = smov [#allocation5]   ;;  %s1498_s11 = scalar_lea.hbm %s1756_s4, 2048 }
  0x14   :  { %s36_s8 = sshll.u32 %s1551_s7, 4  ;;  %p1499_p8 = scmp.ne.s32.totalorder %s1756_s4, %s1498_s11  ;;  %s37_s8 = int_to_ptr.vmem [resolvable:$true] %s36_s8 }
  0x15   :  { %p1502_p9 = scmp.lt.u32.totalorder %s1498_s11, %s1756_s4 }
  0x17   :  { %p1504_p10 = pnand %p1502_p9, %p1499_p8 }
  0x19   :  { %1507 = shalt.err (!%p1504_p10)
}
  0x1a   :  { %s1508_s16 = scalar_lea.vmem %s37_s8, 2048  ;;  %p1513_p12 = scmp.lt.s32.totalorder %s37_s8, %s37_s8 }
  0x1b   :  { %p1509_p11 = scmp.ne.s32.totalorder %s37_s8, %s1508_s16  ;;  %p1514_p13 = scmp.lt.s32.totalorder %s1508_s16, %s1508_s16 }
  0x1d   :  { %p1515_p0 = por %p1514_p13, %p1513_p12 }
  0x1f   :  { %p1516_p1 = pnand %p1515_p0, %p1509_p11 }
  0x21   :  { %1519 = shalt.err (!%p1516_p1)
}
  0x22   :  { %s1552_s3 = smov 256   ;;  %s1553_s17 = smov 16  }
  0x23   :  { %42 = dma.hbm_to_vmem [thread:$0]  %s1756_s4, 2048, %s37_s8, [#allocation6], %s1552_s3, %s1552_s3, %s1553_s17  }
  0x24   :  { %1542 = dma.done.wait [#allocation3], 10752  }
  0x25   :  { %1543 = vsyncadd [#allocation3], 4294956544 }
  0x26   :  { %1544 = dma.done.wait [#allocation6], 2048  }
  0x27   :  { %1545 = vsyncadd [#allocation6], 4294965248  ;;  %vm65_vm0 = vcmask 1041408   ;;  %v54_v0 = vld [vmem:[#allocation2] sm:$0x3]  ;;  %v51_v2 = vld [vmem:[%s1752_s0 + $0x8] sm:$0xff] }
  0x28   :  { %v50_v1 = vld [vmem:[%s1752_s0] sm:$0xff]  ;;  %vm58_vm1 = vcmask 31744   ;;  %1400 = vmatprep.subr.msk.bf16.mxu1 %vm65_vm0, %v54_v0  ;;  %v67_v3 = vsel %vm65_vm0, %v54_v0, 0  ;;  %v52_v5 = vld [vmem:[%s1752_s0 + $0x10] sm:$0xff]  ;;  %v53_v6 = vld [vmem:[%s1752_s0 + $0x18] sm:$0xff]  ;;  %v1554_v9 = vmov 0.0  }
  0x29   :  { %v55_v4 = vpack.c.bf16 %v51_v2, %v50_v1  ;;  %1261 = vmatpush3.bf16.msra.mxu1 %v67_v3  ;;  %v56_v7 = vpack.c.bf16 %v53_v6, %v52_v5  ;;  %v1413_v8 = vld [vmem:[#allocation2 + $0x10] ss:$8 sps:$4 sm:$0xff]   ;;  %1288 = vmatprep.subr.bf16.mxu0 %v1554_v9  ;;  %v1414_v10 = vld [vmem:[#allocation2 + $0x20] ss:$8 sps:$4 sm:$0xff]   ;;  %vm1555_vm2 = vmmov 0   ;;  %vm140_vm3 = vcmask 261120  }
  0x2a   :  { %1266 = vmatprep.subr.bf16.mxu1 %v1554_v9  ;;  %1290 = vmatprep.mubr.msk.bf16.mxu0 %vm1555_vm2, %v1554_v9  ;;  %v57_v11 = vld [vmem:[#allocation5] ss:$0 sm:$0xff]  ;;  %v1415_v25 = vld [vmem:[#allocation2 + $0x30] ss:$8 sps:$4 sm:$0xff]   ;;  %v248_v29 = vld [vmem:[%s1753_s1 + $0x8] sm:$0xff]  ;;  %vm251_vm4 = vcmask 130048   ;;  %v467_v5 = vlaneseq }
  0x2b   :  { %1262 = vmatprep.mubr.msk.bf16.mxu1 %vm58_vm1, %v55_v4  ;;  %v1416_v27 = vld [vmem:[#allocation2 + $0x40] ss:$8 sps:$4 sm:$0xff]   ;;  %v1417_v32 = vld [vmem:[#allocation2 + $0x50] ss:$8 sps:$4 sm:$0xff]   ;;  %v1419_v33 = vld [vmem:[#allocation2 + $0x54] ss:$8 sps:$4 sm:$0xff]  }
  0x2c   :  { %1263 = vmatmul.mubr.msk.bf16.vlgmr.msra.gmra.mrb[0].mxu1 %vm58_vm1, %v56_v7  ;;  %v247_v28 = vld [vmem:[%s1753_s1] sm:$0xff]  ;;  %v1556_v36 = vmov 0   ;;  %v127_v37 = vld [vmem:[#allocation5 + $0x10] ss:$0 sm:$0xff]  ;;  %vm352_vm5 = vcmask 1040384   ;;  %vm348_vm6 = vcmask 15360  }
  0x2d   :  { %1267 = vmatpush3.bf16.msra.mxu1 %v1413_v8  ;;  %1270 = vmatprep.mubr.msk.bf16.mxu1 %vm1555_vm2, %v1554_v9  ;;  %v295_v30 = vpack.c.bf16 %v248_v29, %v247_v28  ;;  %v249_v31 = vld [vmem:[#allocation2 + $0x80] sm:$0x1]  ;;  %v1424_v35 = vld [vmem:[#allocation2 + $0x64] ss:$8 sps:$4 sm:$0xff]   ;;  %v341_v40 = vld [vmem:[#allocation2 + $0x70] sm:$0x11] }
  0x2e   :  { %1268 = vmatprep.subr.bf16.mxu1 %v1554_v9  ;;  %v1422_v34 = vld [vmem:[#allocation2 + $0x60] ss:$8 sps:$4 sm:$0xff]   ;;  %v1158_v45 = vcombine.high %v341_v40, %v341_v40  ;;  %v1157_v46 = vcombine.low %v341_v40, %v341_v40  ;;  %v1425_v58 = vld [vmem:[#allocation2 + $0x90] ss:$8 sps:$4 sm:$0xff]   ;;  %v468_v7 = vshrl.u32 %v467_v5, 7  ;;  %s1557_s1 = smov 126  }
  0x2f   :  { %1289 = vmatpush3.bf16.msra.mxu0 %v295_v30  ;;  %v1426_v59 = vld [vmem:[#allocation2 + $0xa0] ss:$8 sps:$4 sm:$0xff]   ;;  %v1427_v60 = vld [vmem:[#allocation2 + $0xb0] ss:$8 sps:$4 sm:$0xff]   ;;  %s1558_s11 = smov 2  }
  0x30   :  { %423 = vmatprep.subr.bf16.mxu0 %v1419_v33  ;;  %v354_v49 = vsel %vm352_vm5, %v1157_v46, 0  ;;  %v1428_v61 = vld [vmem:[#allocation2 + $0xc0] ss:$8 sps:$4 sm:$0xff]   ;;  %v1429_v62 = vld [vmem:[#allocation2 + $0xd0] ss:$8 sps:$4 sm:$0xff]  }
  0x31   :  { %1269 = vmatpush3.bf16.msra.mxu1 %v1414_v10  ;;  %v1430_v63 = vld [vmem:[#allocation2 + $0xe0] ss:$8 sps:$4 sm:$0xff]   ;;  %v1445_v40 = vld [vmem:[#allocation2 + $0x1d0] ss:$8 sps:$4 sm:$0xff]  }
  0x32   :  { %1274 = vmatprep.subr.bf16.mxu1 %v1554_v9  ;;  %1291 = vmatmul.mubr.msk.bf16.vlgmr.msra.gmra.mrb[0].mxu0 %vm251_vm4, %v249_v31 }
  0x33   :  { %424 = vmatpush1.bf16.msra.mxu0 %v1417_v32  ;;  %455 = vmatprep.mubr.bf16.mxu0 %v1556_v36 }
  0x34   :  { %425 = vmatprep.subr.bf16.mxu0 %v1424_v35  ;;  %v1440_v35 = vld [vmem:[#allocation2 + $0x180] ss:$8 sps:$4 sm:$0xff]  }
  0x37   :  { %426 = vmatpush1.bf16.msra.mxu0 %v1422_v34  ;;  %v1439_v34 = vld [vmem:[#allocation2 + $0x170] ss:$8 sps:$4 sm:$0xff]  }
  0x38   :  { %1314 = vmatprep.subr.bf16.mxu0 %v1554_v9 }
  0xff   :  { %v1264_v12 = vpop.f32.mrb[0].mxu1 }
 0x100   :  { %v112_v13 = vadd.f32 %v1264_v12, %v57_v11  ;;  %v103_v14 = vpop.f32.mrb[1].mxu1  ;;  %v1431_v12 = vld [vmem:[#allocation2 + $0xf0] ss:$8 sps:$4 sm:$0xff]  }
 0x101   :  { %v104_v15 = vadd.f32 %v103_v14, %v57_v11  ;;  %v1265_v16 = vpop.f32.mrb[2].mxu1  ;;  %v465_v14 = vld [vmem:[#allocation5 + $0x30] ss:$8 sm:$0x3] }
 0x102   :  { %v115_v17 = vadd.f32 %v1265_v16, %v57_v11  ;;  %v106_v18 = vpop.f32.mrb[3].mxu1  ;;  %v120_v20 = vmax.f32 %v112_v13, 0.0  ;;  %v1432_v16 = vld [vmem:[#allocation2 + $0x100] ss:$8 sps:$4 sm:$0xff]  }
 0x103   :  { %v107_v19 = vadd.f32 %v106_v18, %v57_v11  ;;  %v118_v22 = vmax.f32 %v104_v15, 0.0  ;;  %v469_v11 = vsub.s32 0, %v468_v7  ;;  %v1434_v18 = vld [vmem:[#allocation2 + $0x120] ss:$8 sps:$4 sm:$0xff]  }
 0x104   :  { %v121_v21 = vmax.f32 %v115_v17, 0.0  ;;  %v1433_v17 = vld [vmem:[#allocation2 + $0x110] ss:$8 sps:$4 sm:$0xff]  }
 0x105   :  { %v119_v23 = vmax.f32 %v107_v19, 0.0  ;;  %v330_v53 = vpop.f32.mrb[0].mxu0  ;;  %v470_v15 = vrot.slane %v465_v14, %v469_v11  ;;  %v1435_v19 = vld [vmem:[#allocation2 + $0x130] ss:$8 sps:$4 sm:$0xff]   ;;  %v1454_v11 = vld [vmem:[#allocation2 + $0x260] ss:$8 sps:$4 sm:$0xff]  }
 0x106   :  { %v189_v24 = vpack.c.bf16 %v121_v21, %v120_v20  ;;  %v342_v54 = vpack.c.bf16 %v330_v53, %v330_v53  ;;  %v1292_v55 = vpop.f32.mrb[1].mxu0  ;;  %v1436_v20 = vld [vmem:[#allocation2 + $0x140] ss:$8 sps:$4 sm:$0xff]   ;;  %v1437_v21 = vld [vmem:[#allocation2 + $0x150] ss:$8 sps:$4 sm:$0xff]  }
 0x107   :  { %v126_v26 = vpack.c.bf16 %v119_v23, %v118_v22  ;;  %v333_v56 = vpop.f32.mrb[2].mxu0  ;;  %v1438_v22 = vld [vmem:[#allocation2 + $0x160] ss:$8 sps:$4 sm:$0xff]   ;;  %v473_v23 = vsub.s32 1, %v468_v7  ;;  %v1451_v7 = vld [vmem:[#allocation2 + $0x230] ss:$8 sps:$4 sm:$0xff]  }
 0x108   :  { %v1293_v57 = vpop.f32.mrb[3].mxu0  ;;  %v1448_v53 = vld [vmem:[#allocation2 + $0x200] ss:$8 sps:$4 sm:$0xff]  }
 0x109   :  { %1271 = vmatmul.mubr.msk.bf16.vlgmr.msra.gmra.mrb[4].mxu1 %vm140_vm3, %v126_v26 }
 0x10a   :  { %1275 = vmatpush3.bf16.msra.mxu1 %v1415_v25  ;;  %1278 = vmatprep.mubr.msk.bf16.mxu1 %vm1555_vm2, %v1554_v9  ;;  %v474_v25 = vrot.slane %v465_v14, %v473_v23 }
 0x10b   :  { %1276 = vmatprep.subr.bf16.mxu1 %v1554_v9 }
 0x10e   :  { %1277 = vmatpush3.bf16.msra.mxu1 %v1416_v27 }
 0x10f   :  { %1282 = vmatprep.subr.bf16.mxu1 %v1554_v9 }
 0x111   :  { %1279 = vmatmul.mubr.msk.bf16.vlgmr.msra.gmra.mrb[8].mxu1 %vm140_vm3, %v189_v24 }
 0x112   :  { %1284 = vmatprep.mubr.msk.bf16.mxu1 %vm1555_vm2, %v1554_v9 }
 0x1dc   :  { %v178_v38 = vpop.f32.mrb[4].mxu1 }
 0x1dd   :  { %v1272_v39 = vpop.f32.mrb[5].mxu1  ;;  %v179_v42 = vadd.f32 %v178_v38, %v127_v37  ;;  %v1443_v38 = vld [vmem:[#allocation2 + $0x1b0] ss:$8 sps:$4 sm:$0xff]  }
 0x1de   :  { %v181_v41 = vpop.f32.mrb[6].mxu1  ;;  %v1444_v39 = vld [vmem:[#allocation2 + $0x1c0] ss:$8 sps:$4 sm:$0xff]  }
 0x1df   :  { %v182_v43 = vadd.f32 %v181_v41, %v127_v37  ;;  %v1273_v44 = vpop.f32.mrb[7].mxu1  ;;  %v1442_v37 = vld [vmem:[#allocation2 + $0x1a0] ss:$8 sps:$4 sm:$0xff]  }
 0x1e0   :  { %v1446_v41 = vld [vmem:[#allocation2 + $0x1e0] ss:$8 sps:$4 sm:$0xff]  }
 0x1e1   :  { %v250_v47 = vpack.c.bf16 %v182_v43, %v179_v42  ;;  %v496_v42 = vld [vmem:[#allocation5 + $0x40] ss:$0 sm:$0xff] }
 0x1e3   :  { %1283 = vmatpush3.bf16.msra.mxu1 %v250_v47 }
 0x1e4   :  { %v1653_v48 = vpop.f32.mrb[8].mxu1  ;;  %1159 = vmatprep.subr.msk.bf16.mxu1 %vm352_vm5, %v1158_v45 }
 0x1e5   :  { %v1280_v50 = vpop.f32.mrb[9].mxu1 }
 0x1e6   :  { %v1657_v51 = vpop.f32.mrb[10].mxu1  ;;  %1285 = vmatmul.mubr.msk.bf16.vlgmr.msra.gmra.mrb[12].mxu1 %vm251_vm4, %v249_v31 }
 0x1e7   :  { %v1281_v52 = vpop.f32.mrb[11].mxu1  ;;  %360 = vmatpush1.bf16.msra.mxu1 %v354_v49  ;;  %391 = vmatprep.mubr.bf16.mxu1 %v1556_v36  ;;  %v1441_v36 = vld [vmem:[#allocation2 + $0x190] ss:$8 sps:$4 sm:$0xff]  }
 0x1e8   :  { %1294 = vmatprep.subr.bf16.mxu1 %v1554_v9  ;;  %v1447_v52 = vld [vmem:[#allocation2 + $0x1f0] ss:$8 sps:$4 sm:$0xff]  }
 0x1ee   :  { %1160 = vmatmul.mubr.msk.bf16.vlgmr.msra.gmra.mrb[16].mxu1 %vm348_vm6, %v342_v54  ;;  %v603_v54 = vld [vmem:[#allocation5 + $0x50] ss:$0 sm:$0xff] }
 0x1ef   :  { %1310 = vmatprep.mubr.msk.bf16.mxu1 %vm1555_vm2, %v1554_v9  ;;  %1295 = vmatpush3.bf16.msra.mxu1 %v1425_v58 }
 0x1f0   :  { %1296 = vmatprep.subr.bf16.mxu1 %v1554_v9 }
 0x1f3   :  { %1297 = vmatpush3.bf16.msra.mxu1 %v1426_v59 }
 0x1f4   :  { %1298 = vmatprep.subr.bf16.mxu1 %v1554_v9 }
 0x1f7   :  { %1299 = vmatpush3.bf16.msra.mxu1 %v1427_v60 }
 0x1f8   :  { %1300 = vmatprep.subr.bf16.mxu1 %v1554_v9 }
 0x1fb   :  { %1301 = vmatpush3.bf16.msra.mxu1 %v1428_v61 }
 0x1fc   :  { %1302 = vmatprep.subr.bf16.mxu1 %v1554_v9 }
 0x1ff   :  { %1303 = vmatpush3.bf16.msra.mxu1 %v1429_v62 }
 0x200   :  { %1304 = vmatprep.subr.bf16.mxu1 %v1554_v9 }
 0x203   :  { %1305 = vmatpush3.bf16.msra.mxu1 %v1430_v63 }
 0x204   :  { %1306 = vmatprep.subr.bf16.mxu1 %v1554_v9 }
 0x207   :  { %1307 = vmatpush3.bf16.msra.mxu1 %v1431_v12  ;;  %v1455_v12 = vld [vmem:[#allocation2 + $0x270] ss:$8 sps:$4 sm:$0xff]  }
 0x208   :  { %1308 = vmatprep.subr.bf16.mxu1 %v1554_v9 }
 0x20b   :  { %1309 = vmatpush3.bf16.msra.mxu1 %v1432_v16 }
 0x20c   :  { %1334 = vmatprep.subr.bf16.mxu1 %v1554_v9 }
 0x2b9   :  { %v289_v0 = vpop.f32.mrb[12].mxu1 }
 0x2ba   :  { %v340_v1 = vpack.c.bf16 %v289_v0, %v289_v0  ;;  %v1286_v2 = vpop.f32.mrb[13].mxu1 }
 0x2bb   :  { %v292_v3 = vpop.f32.mrb[14].mxu1 }
 0x2bc   :  { %v1287_v4 = vpop.f32.mrb[15].mxu1  ;;  %1165 = vmatmul.mubr.msk.bf16.vlgmr.msra.gmra.mrb[4].mxu0 %vm140_vm3, %v340_v1 }
 0x2bd   :  { %1330 = vmatprep.mubr.msk.bf16.mxu0 %vm1555_vm2, %v1554_v9  ;;  %1315 = vmatpush3.bf16.msra.mxu0 %v1433_v17 }
 0x2be   :  { %1316 = vmatprep.subr.bf16.mxu0 %v1554_v9 }
 0x2c1   :  { %v393_v6 = vpop.f32.mrb[16].mxu1  ;;  %1317 = vmatpush3.bf16.msra.mxu0 %v1434_v18 }
 0x2c2   :  { %v395_v8 = vpop.f32.mrb[17].mxu1  ;;  %1318 = vmatprep.subr.bf16.mxu0 %v1554_v9 }
 0x2c3   :  { %v397_v10 = vpop.f32.mrb[18].mxu1 }
 0x2c4   :  { %v398_v13 = vpop.f32.mrb[19].mxu1  ;;  %v1453_v10 = vld [vmem:[#allocation2 + $0x250] ss:$8 sps:$4 sm:$0xff]  }
 0x2c5   :  { %1319 = vmatpush3.bf16.msra.mxu0 %v1435_v19  ;;  %v843_v19 = vld [vmem:[#allocation5 + $0x60] ss:$0 sm:$0xff] }
 0x2c6   :  { %1320 = vmatprep.subr.bf16.mxu0 %v1554_v9 }
 0x2c9   :  { %1321 = vmatpush3.bf16.msra.mxu0 %v1436_v20 }
 0x2ca   :  { %1322 = vmatprep.subr.bf16.mxu0 %v1554_v9 }
 0x2cd   :  { %1323 = vmatpush3.bf16.msra.mxu0 %v1437_v21  ;;  %v845_v21 = vld [vmem:[#allocation5 + $0x70] ss:$0 sm:$0xff] }
 0x2ce   :  { %1324 = vmatprep.subr.bf16.mxu0 %v1554_v9 }
 0x2d1   :  { %1325 = vmatpush3.bf16.msra.mxu0 %v1438_v22 }
 0x2d2   :  { %1326 = vmatprep.subr.bf16.mxu0 %v1554_v9 }
 0x2d5   :  { %1327 = vmatpush3.bf16.msra.mxu0 %v1439_v34 }
 0x2d6   :  { %1328 = vmatprep.subr.bf16.mxu0 %v1554_v9 }
 0x2d9   :  { %1329 = vmatpush3.bf16.msra.mxu0 %v1440_v35 }
 0x2da   :  { %1354 = vmatprep.subr.bf16.mxu0 %v1554_v9 }
 0x38f   :  { %v457_v24 = vpop.f32.mrb[4].mxu0 }
 0x390   :  { %v458_v26 = vadd.f32 %v457_v24, %v393_v6  ;;  %v459_v27 = vpop.f32.mrb[5].mxu0  ;;  %v1450_v6 = vld [vmem:[#allocation2 + $0x220] ss:$8 sps:$4 sm:$0xff]  }
 0x391   :  { %v460_v28 = vadd.f32 %v459_v27, %v395_v8  ;;  %v461_v29 = vpop.f32.mrb[6].mxu0  ;;  %v1452_v8 = vld [vmem:[#allocation2 + $0x240] ss:$8 sps:$4 sm:$0xff]  }
 0x392   :  { %v1682_v30 = vadd.f32 %v470_v15, %v458_v26  ;;  %v462_v31 = vpop.f32.mrb[7].mxu0  ;;  %v1449_v26 = vld [vmem:[#allocation2 + $0x210] ss:$8 sps:$4 sm:$0xff]   ;;  %v1456_v27 = vld [vmem:[#allocation2 + $0x280] ss:$8 sps:$4 sm:$0xff]  }
 0x393   :  { %v478_v32 = vadd.f32 %v474_v25, %v460_v28  ;;  %v1457_v28 = vld [vmem:[#allocation2 + $0x290] ss:$8 sps:$4 sm:$0xff]   ;;  %v190_v29 = vld [vmem:[#allocation5 + $0x20] ss:$0 sm:$0xff] }
 0x395   :  { %v495_v33 = vpack.c.bf16 %v478_v32, %v478_v32  ;;  %v244_v32 = vadd.f32 %v1657_v51, %v190_v29 }
 0x397   :  { %1311 = vmatmul.mubr.bf16.vlgmr.msra.gmra.mrb[20].mxu1 %v495_v33 }
 0x398   :  { %1350 = vmatprep.mubr.msk.bf16.mxu1 %vm1555_vm2, %v1554_v9  ;;  %1335 = vmatpush3.bf16.msra.mxu1 %v1441_v36 }
 0x399   :  { %1336 = vmatprep.subr.bf16.mxu1 %v1554_v9 }
 0x39c   :  { %1337 = vmatpush3.bf16.msra.mxu1 %v1442_v37 }
 0x39d   :  { %1338 = vmatprep.subr.bf16.mxu1 %v1554_v9 }
 0x3a0   :  { %1339 = vmatpush3.bf16.msra.mxu1 %v1443_v38 }
 0x3a1   :  { %1340 = vmatprep.subr.bf16.mxu1 %v1554_v9 }
 0x3a4   :  { %1341 = vmatpush3.bf16.msra.mxu1 %v1444_v39 }
 0x3a5   :  { %1342 = vmatprep.subr.bf16.mxu1 %v1554_v9 }
 0x3a8   :  { %1343 = vmatpush3.bf16.msra.mxu1 %v1445_v40 }
 0x3a9   :  { %1344 = vmatprep.subr.bf16.mxu1 %v1554_v9 }
 0x3ac   :  { %1345 = vmatpush3.bf16.msra.mxu1 %v1446_v41 }
 0x3ad   :  { %1346 = vmatprep.subr.bf16.mxu1 %v1554_v9 }
 0x3b0   :  { %1347 = vmatpush3.bf16.msra.mxu1 %v1447_v52 }
 0x3b1   :  { %1348 = vmatprep.subr.bf16.mxu1 %v1554_v9 }
 0x3b4   :  { %1349 = vmatpush3.bf16.msra.mxu1 %v1448_v53 }
 0x3b5   :  { %1374 = vmatprep.subr.bf16.mxu1 %v1554_v9 }
 0x46a   :  { %v579_v43 = vpop.f32.mrb[20].mxu1 }
 0x46b   :  { %v580_v44 = vadd.f32 %v579_v43, %v496_v42  ;;  %v1312_v45 = vpop.f32.mrb[21].mxu1 }
 0x46c   :  { %v582_v46 = vpop.f32.mrb[22].mxu1 }
 0x46d   :  { %v585_v47 = vmax.f32 %v580_v44, 0.0  ;;  %v1313_v49 = vpop.f32.mrb[23].mxu1 }
 0x46f   :  { %v602_v50 = vpack.c.bf16 %v585_v47, %v585_v47 }
 0x471   :  { %1331 = vmatmul.mubr.bf16.vlgmr.msra.gmra.mrb[8].mxu0 %v602_v50 }
 0x472   :  { %1355 = vmatpush3.bf16.msra.mxu0 %v1441_v36  ;;  %1370 = vmatprep.mubr.msk.bf16.mxu0 %vm1555_vm2, %v1554_v9 }
 0x473   :  { %1356 = vmatprep.subr.bf16.mxu0 %v1554_v9 }
 0x476   :  { %1357 = vmatpush3.bf16.msra.mxu0 %v1442_v37 }
 0x477   :  { %1358 = vmatprep.subr.bf16.mxu0 %v1554_v9 }
 0x47a   :  { %1359 = vmatpush3.bf16.msra.mxu0 %v1443_v38 }
 0x47b   :  { %1360 = vmatprep.subr.bf16.mxu0 %v1554_v9 }
 0x47e   :  { %1361 = vmatpush3.bf16.msra.mxu0 %v1444_v39 }
 0x47f   :  { %1362 = vmatprep.subr.bf16.mxu0 %v1554_v9 }
 0x482   :  { %1363 = vmatpush3.bf16.msra.mxu0 %v1445_v40 }
 0x483   :  { %1364 = vmatprep.subr.bf16.mxu0 %v1554_v9 }
 0x486   :  { %1365 = vmatpush3.bf16.msra.mxu0 %v1446_v41 }
 0x487   :  { %1366 = vmatprep.subr.bf16.mxu0 %v1554_v9 }
 0x48a   :  { %1367 = vmatpush3.bf16.msra.mxu0 %v1447_v52 }
 0x48b   :  { %1368 = vmatprep.subr.bf16.mxu0 %v1554_v9 }
 0x48e   :  { %1369 = vmatpush3.bf16.msra.mxu0 %v1448_v53 }
 0x48f   :  { %1380 = vmatprep.subr.bf16.mxu0 %v1554_v9 }
 0x544   :  { %v686_v55 = vpop.f32.mrb[8].mxu0 }
 0x545   :  { %v687_v56 = vadd.f32 %v686_v55, %v603_v54  ;;  %v1332_v57 = vpop.f32.mrb[9].mxu0 }
 0x546   :  { %v689_v58 = vpop.f32.mrb[10].mxu0  ;;  %v1011_v57 = vand.u32 127, %v467_v5 }
 0x547   :  { %v692_v59 = vadd.f32 %v687_v56, %v1682_v30  ;;  %v1333_v60 = vpop.f32.mrb[11].mxu0  ;;  %v241_v30 = vadd.f32 %v1653_v48, %v190_v29 }
 0x548   :  { %vm1012_vm8 = vcmp.ge.s32.totalorder %v1011_v57, 2  ;;  %vm1013_vm10 = vcmp.lt.s32.totalorder %v1011_v57, 4 }
 0x549   :  { %v709_v61 = vpack.c.bf16 %v692_v59, %v692_v59  ;;  %vm1014_vm11 = vmand %vm1012_vm8, %vm1013_vm10 }
 0x54b   :  { %1351 = vmatmul.mubr.bf16.vlgmr.msra.gmra.mrb[24].mxu1 %v709_v61 }
 0x54c   :  { %1376 = vmatprep.mubr.msk.bf16.mxu1 %vm1555_vm2, %v1554_v9 }
 0x61e   :  { %v792_v62 = vpop.f32.mrb[24].mxu1 }
 0x61f   :  { %v798_v63 = vsub.f32 %v692_v59, %v792_v62  ;;  %v1352_v0 = vpop.f32.mrb[25].mxu1 }
 0x620   :  { %v795_v1 = vpop.f32.mrb[26].mxu1 }
 0x621   :  { %v799_v2 = vmul.f32 %v798_v63, %v798_v63  ;;  %v1353_v3 = vpop.f32.mrb[27].mxu1 }
 0x623   :  { %v800_v4 = vpack.c.bf16 %v799_v2, %v799_v2 }
 0x625   :  { %1371 = vmatmul.mubr.bf16.vlgmr.msra.gmra.mrb[12].mxu0 %v800_v4 }
 0x626   :  { %1396 = vmatprep.mubr.msk.bf16.mxu0 %vm1555_vm2, %v1554_v9  ;;  %1381 = vmatpush3.bf16.msra.mxu0 %v1450_v6 }
 0x627   :  { %1382 = vmatprep.subr.bf16.mxu0 %v1554_v9 }
 0x62a   :  { %1383 = vmatpush3.bf16.msra.mxu0 %v1451_v7 }
 0x62b   :  { %1384 = vmatprep.subr.bf16.mxu0 %v1554_v9 }
 0x62e   :  { %1385 = vmatpush3.bf16.msra.mxu0 %v1452_v8 }
 0x62f   :  { %1386 = vmatprep.subr.bf16.mxu0 %v1554_v9 }
 0x632   :  { %1387 = vmatpush3.bf16.msra.mxu0 %v1453_v10 }
 0x633   :  { %1388 = vmatprep.subr.bf16.mxu0 %v1554_v9 }
 0x636   :  { %1389 = vmatpush3.bf16.msra.mxu0 %v1454_v11 }
 0x637   :  { %1390 = vmatprep.subr.bf16.mxu0 %v1554_v9 }
 0x63a   :  { %1391 = vmatpush3.bf16.msra.mxu0 %v1455_v12 }
 0x63b   :  { %1392 = vmatprep.subr.bf16.mxu0 %v1554_v9 }
 0x63e   :  { %1393 = vmatpush3.bf16.msra.mxu0 %v1456_v27 }
 0x63f   :  { %1394 = vmatprep.subr.bf16.mxu0 %v1554_v9 }
 0x642   :  { %1395 = vmatpush3.bf16.msra.mxu0 %v1457_v28 }
 0x6f8   :  { %v835_v13 = vpop.f32.mrb[12].mxu0 }
 0x6f9   :  { %v836_v14 = vadd.f32 1e-05, %v835_v13  ;;  %v1372_v15 = vpop.f32.mrb[13].mxu0 }
 0x6fa   :  { %v838_v16 = vpop.f32.mrb[14].mxu0 }
 0x6fb   :  { %1458 = vrsqrt.f32 %v836_v14  ;;  %v1373_v17 = vpop.f32.mrb[15].mxu0  ;;  %v1051_v16 = vld [vmem:[%s1754_s2] sm:$0xff] }
 0x705   :  { %v1459_v18 = vpop.eup %1458 }
 0x706   :  { %v842_v20 = vmul.f32 %v1459_v18, %v798_v63 }
 0x708   :  { %v844_v22 = vmul.f32 %v843_v19, %v842_v20  ;;  %v1052_v19 = vld [vmem:[%s1754_s2 + $0x8] sm:$0xff]  ;;  %s1559_s2 = smov [#allocation7]  }
 0x709   :  { %s1134_s12 = sshll.u32 %s1559_s2, 4  ;;  %s1135_s12 = int_to_ptr.vmem [resolvable:$true] %s1134_s12 }
 0x70a   :  { %v846_v23 = vadd.f32 %v845_v21, %v844_v22  ;;  %s1520_s13 = scalar_lea.vmem %s1135_s12, 512  ;;  %p1525_p3 = scmp.lt.s32.totalorder %s1135_s12, %s1135_s12 }
 0x70b   :  { %p1521_p2 = scmp.ne.s32.totalorder %s1135_s12, %s1520_s13  ;;  %p1526_p4 = scmp.lt.s32.totalorder %s1520_s13, %s1520_s13 }
 0x70c   :  { %v849_v24 = vpack.c.bf16 %v846_v23, %v846_v23 }
 0x70d   :  { %p1527_p5 = por %p1526_p4, %p1525_p3 }
 0x70e   :  { %v859_v25 = vsel %vm352_vm5, %v849_v24, 0 }
 0x70f   :  { %1375 = vmatpush3.bf16.msra.mxu1 %v859_v25  ;;  %p1528_p6 = pnand %p1527_p5, %p1521_p2 }
 0x712   :  { %1377 = vmatmul.mubr.msk.bf16.vlgmr.msra.gmra.mrb[28].mxu1 %vm348_vm6, %v1449_v26 }
 0x7e5   :  { %v895_v31 = vpop.f32.mrb[28].mxu1 }
 0x7e6   :  { %v902_v33 = vmul.f32 %v895_v31, %v241_v30  ;;  %v1378_v34 = vpop.f32.mrb[29].mxu1 }
 0x7e7   :  { %v898_v35 = vpop.f32.mrb[30].mxu1 }
 0x7e8   :  { %v903_v36 = vmul.f32 %v898_v35, %v244_v32  ;;  %v1379_v37 = vpop.f32.mrb[31].mxu1 }
 0x7ea   :  { %v920_v38 = vpack.c.bf16 %v903_v36, %v902_v33 }
 0x7ec   :  { %1397 = vmatmul.mubr.bf16.vlgmr.msra.gmra.mrb[16].mxu0 %v920_v38 }
 0x8bf   :  { %v1003_v39 = vpop.f32.mrb[16].mxu0 }
 0x8c0   :  { %v1017_v40 = vand.u32 2147483647, %v1003_v39  ;;  %v1398_v41 = vpop.f32.mrb[17].mxu0  ;;  %v1015_v63 = vmax.f32 %v1003_v39, 0.0 }
 0x8c1   :  { %v1006_v42 = vpop.f32.mrb[18].mxu0 }
 0x8c2   :  { %v1019_v9 = vsub.f32 0.0, %v1017_v40  ;;  %v1018_v43 = vand.u32 2147483647, %v1006_v42  ;;  %v1399_v44 = vpop.f32.mrb[19].mxu0  ;;  %v1016_v4 = vmax.f32 %v1006_v42, 0.0 }
 0x8c4   :  { %v1021_v45 = vmul.f32 1.442695, %v1019_v9  ;;  %v1020_v46 = vsub.f32 0.0, %v1018_v43 }
 0x8c6   :  { %1460 = vpow2.f32 %v1021_v45  ;;  %v1023_v48 = vmul.f32 1.442695, %v1020_v46 }
 0x8c8   :  { %1462 = vpow2.f32 %v1023_v48 }
 0x8d0   :  { %v1461_v51 = vpop.eup %1460 }
 0x8d1   :  { %v1025_v47 = vadd.f32 1.0, %v1461_v51  ;;  %v1028_v52 = vmul.f32 -0.5, %v1461_v51  ;;  %v1031_v55 = vand.u32 2147483647, %v1461_v51 }
 0x8d2   :  { %v1463_v49 = vpop.eup %1462 }
 0x8d3   :  { %1464 = vlog2.f32 %v1025_v47  ;;  %v1034_v50 = vadd.f32 1.0, %v1463_v49  ;;  %v1037_v53 = vmul.f32 -0.5, %v1463_v49  ;;  %v1029_v54 = vadd.f32 1.0, %v1028_v52 }
 0x8d4   :  { %v1040_v59 = vand.u32 2147483647, %v1463_v49  ;;  %vm1032_vm7 = vcmp.lt.f32.partialorder %v1031_v55, 0.0004427343 }
 0x8d5   :  { %1466 = vlog2.f32 %v1034_v50  ;;  %v1038_v56 = vadd.f32 1.0, %v1037_v53  ;;  %v1030_v61 = vmul.f32 %v1461_v51, %v1029_v54 }
 0x8d6   :  { %vm1041_vm9 = vcmp.lt.f32.partialorder %v1040_v59, 0.0004427343 }
 0x8d7   :  { %v1039_v2 = vmul.f32 %v1463_v49, %v1038_v56 }
 0x8dd   :  { %v1465_v58 = vpop.eup %1464 }
 0x8de   :  { %v1027_v60 = vmul.f32 0.6931472, %v1465_v58 }
 0x8df   :  { %v1467_v62 = vpop.eup %1466 }
 0x8e0   :  { %v1033_v0 = vsel %vm1032_vm7, %v1030_v61, %v1027_v60  ;;  %v1036_v1 = vmul.f32 0.6931472, %v1467_v62 }
 0x8e1   :  { %v1043_v3 = vadd.f32 %v1033_v0, %v1015_v63 }
 0x8e2   :  { %v1042_v6 = vsel %vm1041_vm9, %v1039_v2, %v1036_v1 }
 0x8e3   :  { %v1045_v7 = vmul.f32 0.9, %v1043_v3  ;;  %v1044_v8 = vadd.f32 %v1042_v6, %v1016_v4 }
 0x8e5   :  { %v1047_v5 = vadd.f32 0.1, %v1045_v7  ;;  %v1046_v10 = vmul.f32 0.9, %v1044_v8 }
 0x8e7   :  { %v1048_v11 = vadd.f32 0.1, %v1046_v10  ;;  %v1049_v12 = vsel %vm1014_vm11, %v1047_v5, %v1003_v39 }
 0x8e8   :  { %1057 = vrot.lane.b32.xlu0 %v1049_v12, %s1557_s1  ;;  %1125 = vst [vmem:[#allocation7] sm:$0xff] %v1049_v12  ;;  %v1053_v17 = vsub.f32 %v1051_v16, %v1049_v12 }
 0x8e9   :  { %v1050_v13 = vsel %vm1014_vm11, %v1048_v11, %v1006_v42 }
 0x8ea   :  { %1126 = vst [vmem:[#allocation7 + $0x8] sm:$0xff] %v1050_v13  ;;  %v1054_v21 = vsub.f32 %v1052_v19, %v1050_v13  ;;  %v1087_v40 = vmul.f32 %v1053_v17, %v1053_v17 }
 0x8ec   :  { %1059 = vrot.lane.b32.xlu0 %v1050_v13, %s1557_s1  ;;  %v1111_v42 = vsel %vm348_vm6, %v1087_v40, 0.0  ;;  %v1088_v43 = vmul.f32 %v1054_v21, %v1054_v21 }
 0x8ee   :  { %v1114_v44 = vsel %vm348_vm6, %v1088_v43, 0.0 }
 0x95a   :  { %v1058_v14 = vpop.permute.xlu0 %1057 }
 0x95b   :  { %1468 = vrcp.f32 %v1058_v14 }
 0x95e   :  { %v1060_v15 = vpop.permute.xlu0 %1059 }
 0x95f   :  { %1470 = vrcp.f32 %v1060_v15 }
 0x960   :  { %1472 = vlog2.f32 %v1049_v12 }
 0x961   :  { %1474 = vlog2.f32 %v1050_v13 }
 0x965   :  { %v1469_v18 = vpop.eup %1468 }
 0x966   :  { %v1064_v20 = vmul.f32 %v1469_v18, %v1053_v17 }
 0x968   :  { %v1073_v22 = vmul.f32 0.5, %v1064_v20 }
 0x969   :  { %v1471_v23 = vpop.eup %1470 }
 0x96a   :  { %v1075_v24 = vmul.f32 %v1073_v22, %v1064_v20  ;;  %v1066_v25 = vmul.f32 %v1471_v23, %v1054_v21  ;;  %v1473_v28 = vpop.eup %1472 }
 0x96b   :  { %v1068_v29 = vmul.f32 0.6931472, %v1473_v28  ;;  %v1475_v30 = vpop.eup %1474 }
 0x96c   :  { %1079 = vrot.lane.b32.xlu1 %v1075_v24, %s1558_s11  ;;  %v1074_v26 = vmul.f32 0.5, %v1066_v25  ;;  %v1070_v32 = vmul.f32 0.6931472, %v1475_v30 }
 0x96d   :  { %v1071_v31 = vadd.f32 0.9189385, %v1068_v29 }
 0x96e   :  { %v1076_v27 = vmul.f32 %v1074_v26, %v1066_v25  ;;  %v1072_v35 = vadd.f32 0.9189385, %v1070_v32 }
 0x970   :  { %1081 = vrot.lane.b32.xlu1 %v1076_v27, %s1558_s11 }
 0x9de   :  { %v1080_v33 = vpop.permute.xlu1 %1079 }
 0x9df   :  { %v1085_v34 = vadd.f32 %v1080_v33, %v1071_v31 }
 0x9e1   :  { %1091 = vrot.lane.b32.xlu0 %v1085_v34, %s1557_s1 }
 0x9e2   :  { %v1082_v36 = vpop.permute.xlu1 %1081 }
 0x9e3   :  { %v1086_v37 = vadd.f32 %v1082_v36, %v1072_v35 }
 0x9e5   :  { %1093 = vrot.lane.b32.xlu1 %v1086_v37, %s1557_s1 }
 0xa53   :  { %v1092_v38 = vpop.permute.xlu0 %1091 }
 0xa54   :  { %v1097_v39 = vsel %vm348_vm6, %v1092_v38, 0.0 }
 0xa55   :  { %1098 = vadd.xlane.f32.xlu0 %v1097_v39 }
 0xa57   :  { %v1094_v41 = vpop.permute.xlu1 %1093 }
 0xa58   :  { %v1100_v9 = vsel %vm348_vm6, %v1094_v41, 0.0 }
 0xa59   :  { %1112 = vadd.xlane.f32.xlu0 %v1111_v42  ;;  %1101 = vadd.xlane.f32.xlu1 %v1100_v9 }
 0xa5d   :  { %1115 = vadd.xlane.f32.xlu0 %v1114_v44 }
 0xae2   :  { %v1099_v45 = vpop.xlane.xlu0 %1098 }
 0xae6   :  { %v1113_v46 = vpop.xlane.xlu0 %1112  ;;  %v1102_v48 = vpop.xlane.xlu1 %1101 }
 0xae7   :  { %v1103_v51 = vadd.f32 %v1102_v48, %v1099_v45 }
 0xae9   :  { %v1104_v47 = vrot.slane %v1103_v51, 4 }
 0xaea   :  { %v1116_v49 = vpop.xlane.xlu0 %1115 }
 0xaeb   :  { %v1105_v50 = vadd.f32 %v1104_v47, %v1103_v51  ;;  %v1117_v52 = vadd.f32 %v1116_v49, %v1113_v46 }
 0xaed   :  { %v1106_v53 = vrot.slane %v1105_v50, 2  ;;  %v1118_v54 = vrot.slane %v1117_v52, 4 }
 0xaef   :  { %v1107_v55 = vadd.f32 %v1106_v53, %v1105_v50  ;;  %v1119_v56 = vadd.f32 %v1118_v54, %v1117_v52 }
 0xaf1   :  { %v1108_v57 = vrot.slane %v1107_v55, 1  ;;  %v1120_v58 = vrot.slane %v1119_v56, 2 }
 0xaf3   :  { %v1109_v59 = vadd.f32 %v1108_v57, %v1107_v55  ;;  %v1121_v60 = vadd.f32 %v1120_v58, %v1119_v56 }
 0xaf5   :  { %v1110_v61 = vmul.f32 0.0625, %v1109_v59  ;;  %v1122_v62 = vrot.slane %v1121_v60, 1 }
 0xaf7   :  { %1127 = vst [vmem:[#allocation7 + $0x10] sm:$0xff] %v1110_v61  ;;  %v1123_v63 = vadd.f32 %v1122_v62, %v1121_v60 }
 0xaf9   :  { %v1124_v0 = vmul.f32 0.03125, %v1123_v63 }
 0xafb   :  { %1128 = vst [vmem:[#allocation7 + $0x18] sm:$0xff] %v1124_v0 }
 0xafc   :  { %1531 = shalt.err (!%p1528_p6)
}
 0xafd   :  { %s1532_s16 = scalar_lea.hbm %s1757_s5, 512 }
 0xafe   :  { %p1533_p7 = scmp.ne.s32.totalorder %s1757_s5, %s1532_s16  ;;  %p1536_p8 = scmp.lt.u32.totalorder %s1532_s16, %s1757_s5 }
 0xb00   :  { %p1538_p9 = pnand %p1536_p8, %p1533_p7 }
 0xb02   :  { %1541 = shalt.err (!%p1538_p9)
}
 0xb03   :  { %1140 = dma.vmem_to_hbm [thread:$0]  %s1135_s12, 512, %s1757_s5, [#allocation4], %s1549_s28, %s1549_s28, %s1550_s29  }
 0xb04   :  { %1546 = dma.done.wait [#allocation4], 512  }
 0xb05   :  { %1547 = vsyncadd [#allocation4], 4294966784 }
 0xb06   :  { %1144 = vsyncpa [#allocation3], 1 }
 0xb07   :  { %1145 = vsyncpa [#allocation6], 1 }
 0xb08   :  { %1146 = vsyncpa [#allocation4], 1 }

</bundles_post_ra>
